<compile_context>
chip_gen: v6e
topology: v6e:2x2x1
jax: 0.10.0
libtpu: 0.0.40
codegen_flags: <defaults>
</compile_context>

<pallas_src>
from functools import partial

import jax
import jax.numpy as jnp
from jax.experimental import pallas as pl
from jax.experimental.pallas import tpu as pltpu


def _patch_embed_kernel(p_ref, w_ref, b_ref, o_ref):
    # MXU matmul (bf16 in, f32 accumulate), bias add on the VPU in f32,
    # single cast to the output dtype (lane-dense store: Ep % 128 == 0).
    acc = jnp.dot(p_ref[...], w_ref[...], preferred_element_type=jnp.float32)
    o_ref[...] = (acc + b_ref[...]).astype(o_ref.dtype)


def _round_up(v, m):
    return (v + m - 1) // m * m


def prepare_patch_embed_params(weight, bias, compute_dtype=jnp.bfloat16):
    """One-time parameter repack + pad (do at init, not per forward call).

    weight: (E, C, P, P)  [PyTorch Conv2d OIHW layout]
    bias:   (E,)
    Returns:
      w_mat: (K, Ep) compute_dtype, K = C*P*P flattened in (c, kh, kw) order,
             Ep = E rounded up to a lane multiple (128); pad columns are zero.
      b_mat: (1, Ep) float32, zero-padded.
    """
    E = weight.shape[0]
    K = weight.shape[1] * weight.shape[2] * weight.shape[3]
    Ep = _round_up(E, 128)
    w_mat = weight.reshape(E, K).T.astype(compute_dtype)          # (K, E)
    w_mat = jnp.pad(w_mat, ((0, 0), (0, Ep - E)))                 # (K, Ep)
    b_mat = jnp.pad(bias.reshape(1, E).astype(jnp.float32),
                    ((0, 0), (0, Ep - E)))                        # (1, Ep)
    return w_mat, b_mat


def _pick_tm(tm, M, K, Ep, in_bytes, out_bytes, vmem_budget=12 * 1024 * 1024):
    """Largest M tile <= tm whose double-buffered footprint fits a conservative
    scoped-VMEM budget (12 MiB keeps clear of v5e's 16 MiB default scoped limit
    and is trivial for v6e's 128 MiB / v7x's 64 MiB)."""
    tm_eff = min(tm, _round_up(M, 8))
    fixed = 2 * (K * Ep * in_bytes + Ep * 4)        # weight + bias double buffers
    while tm_eff > 8:
        per_tile = 2 * tm_eff * (K * in_bytes + Ep * out_bytes)
        if fixed + per_tile <= vmem_budget:
            break
        tm_eff = max(8, (tm_eff // 2) // 8 * 8)
    return tm_eff


@partial(jax.jit, static_argnames=("patch_size", "embed_dim", "tm", "out_dtype"))
def patch_embed(x, w_mat, b_mat, patch_size, embed_dim, *, tm=1024, out_dtype=None):
    """x: (B, C, H, W); w_mat (K, Ep) / b_mat (1, Ep) from prepare_patch_embed_params.
    Returns (B, num_patches, embed_dim) in out_dtype (default: compute dtype)."""
    B, C, H, W = x.shape
    P = patch_size
    if H % P != 0 or W % P != 0:
        raise ValueError(f"Image size ({H},{W}) not divisible by patch size {P}.")
    nh, nw = H // P, W // P
    num_patches = nh * nw
    M = B * num_patches
    K = C * P * P
    Ep = w_mat.shape[1]
    E = embed_dim
    compute_dtype = w_mat.dtype
    if out_dtype is None:
        out_dtype = compute_dtype

    # im2col patch extraction; (c, kh, kw) flatten order matches the OIHW
    # weight repack. XLA fuses the transpose + bf16 cast into one relayout
    # pass; no pad copies are made (K is a full-dim block, ragged M handled
    # by the cdiv grid with masked output stores).
    # TODO(synk): fuse this relayout into the kernel to avoid materializing
    # the (M, K) matrix in HBM.
    patches = x.reshape(B, C, nh, P, nw, P)
    patches = patches.transpose(0, 2, 4, 1, 3, 5).reshape(M, K)
    patches = patches.astype(compute_dtype)

    in_bytes = jnp.dtype(compute_dtype).itemsize
    out_bytes = jnp.dtype(out_dtype).itemsize
    tm_eff = _pick_tm(tm, M, K, Ep, in_bytes, out_bytes)
    grid = (pl.cdiv(M, tm_eff),)
    # TODO(synk): if K = C*P*P grows beyond ~2K, add a trailing "arbitrary"
    # K grid axis with a VMEM f32 accumulator + pl.when init/finalize.

    out = pl.pallas_call(
        _patch_embed_kernel,
        out_shape=jax.ShapeDtypeStruct((M, Ep), out_dtype),
        grid_spec=pltpu.PrefetchScalarGridSpec(
            num_scalar_prefetch=0,
            grid=grid,
            in_specs=[
                # Activation tile: (tm, K) with K as a full-dim block (no pad).
                pl.BlockSpec((tm_eff, K), lambda i: (i, 0)),
                # Weight: VMEM-resident, DMA'd once (constant block index).
                pl.BlockSpec((K, Ep), lambda i: (0, 0)),
                # Bias: VMEM-resident, DMA'd once.
                pl.BlockSpec((1, Ep), lambda i: (0, 0)),
            ],
            out_specs=pl.BlockSpec((tm_eff, Ep), lambda i: (i, 0)),
        ),
        compiler_params=pltpu.CompilerParams(
            dimension_semantics=("parallel",),
        ),
    )(patches, w_mat, b_mat)

    # Strip lane padding on E (no-op when E % 128 == 0), reshape to
    # (B, num_patches, embed_dim) -- matches .flatten(2).transpose(1, 2).
    return out[:, :E].reshape(B, num_patches, E)


if __name__ == "__main__":
    # Small shapes consistent with the module:
    #   img_size=16, patch_size=4, in_chans=4, embed_dim=32 -> num_patches = 16
    B, C, H, W = 2, 4, 16, 16
    P = 4
    E = 32

    key = jax.random.PRNGKey(0)
    kx, kw, kb = jax.random.split(key, 3)
    x = jax.random.normal(kx, (B, C, H, W), dtype=jnp.float32)
    weight = jax.random.normal(kw, (E, C, P, P), dtype=jnp.float32) * 0.02
    bias = jax.random.normal(kb, (E,), dtype=jnp.float32) * 0.01

    # One-time parameter repack + pad (hoisted out of the per-call path).
    w_mat, b_mat = prepare_patch_embed_params(weight, bias)

    y = patch_embed(x, w_mat, b_mat, P, E)
    jax.block_until_ready(y)

    # Reference: lax conv (same semantics as nn.Conv2d stride=kernel), f32.
    ref = jax.lax.conv_general_dilated(
        x, weight, window_strides=(P, P), padding="VALID",
        dimension_numbers=("NCHW", "OIHW", "NCHW"))
    ref = ref + bias.reshape(1, E, 1, 1)
    ref = ref.reshape(B, E, -1).transpose(0, 2, 1)        # flatten(2).transpose(1,2)

    assert y.shape == (B, (H // P) * (W // P), E)
    # bf16 inputs/output with f32 accumulation -> relaxed tolerance vs f32 ref.
    y32 = y.astype(jnp.float32)
    max_err = float(jnp.max(jnp.abs(y32 - ref)))
    assert jnp.allclose(y32, ref, atol=2e-2, rtol=2e-2), f"max abs err {max_err}"

    print("KERNEL_OK")
</pallas_src>

<mosaic_0001>
module attributes {stable_mosaic.version = 11 : i64} {
  func.func @_patch_embed_kernel(%arg0: i32, %arg1: memref<32x64xbf16, #tpu.memory_space<vmem>>, %arg2: memref<64x128xbf16, #tpu.memory_space<vmem>>, %arg3: memref<1x128xf32, #tpu.memory_space<vmem>>, %arg4: memref<32x128xbf16, #tpu.memory_space<vmem>>) attributes {dimension_semantics = [#tpu.dimension_semantics<parallel>], iteration_bounds = array<i64: 1>, scalar_prefetch = 0 : i64, scratch_operands = 0 : i64, tpu.core_type = #tpu.core_type<tc>, window_params = [{transform_indices = @transform_0, window_bounds = array<i64: 32, 64>}, {pipeline_mode = #tpu.pipeline_mode<synchronous>, transform_indices = @transform_1, window_bounds = array<i64: 64, 128>}, {pipeline_mode = #tpu.pipeline_mode<synchronous>, transform_indices = @transform_2, window_bounds = array<i64: 1, 128>}, {transform_indices = @transform_3, window_bounds = array<i64: 32, 128>}]} {
    %c0 = arith.constant 0 : index
    %c0_0 = arith.constant 0 : index
    %0 = vector.load %arg1[%c0, %c0_0] : memref<32x64xbf16, #tpu.memory_space<vmem>>, vector<32x64xbf16>
    %c0_1 = arith.constant 0 : index
    %c0_2 = arith.constant 0 : index
    %1 = vector.load %arg2[%c0_1, %c0_2] : memref<64x128xbf16, #tpu.memory_space<vmem>>, vector<64x128xbf16>
    %cst = arith.constant dense<0.000000e+00> : vector<32x128xf32>
    %2 = tpu.matmul %0, %1, %cst {dimension_numbers = #tpu.dot_dimension_numbers<[1], [0], [0], [1], [0, 0, 1, 1], [], []>} : vector<32x64xbf16>, vector<64x128xbf16>, vector<32x128xf32> -> vector<32x128xf32>
    %c0_3 = arith.constant 0 : index
    %c0_4 = arith.constant 0 : index
    %3 = vector.load %arg3[%c0_3, %c0_4] : memref<1x128xf32, #tpu.memory_space<vmem>>, vector<1x128xf32>
    %4 = vector.broadcast %3 : vector<1x128xf32> to vector<32x128xf32>
    %5 = arith.addf %2, %4 : vector<32x128xf32>
    %6 = arith.truncf %5 : vector<32x128xf32> to vector<32x128xbf16>
    %c0_5 = arith.constant 0 : index
    %c0_6 = arith.constant 0 : index
    %7 = vector.load %arg4[%c0_5, %c0_6] : memref<32x128xbf16, #tpu.memory_space<vmem>>, vector<32x128xbf16>
    tpu.vector_store %arg4[%c0_5, %c0_6], %6 {strides = array<i32>} : memref<32x128xbf16, #tpu.memory_space<vmem>>, vector<32x128xbf16>,
    return
  }
  func.func @transform_0(%arg0: i32) -> (i32, i32) {
    %c0_i32 = arith.constant 0 : i32
    %c0_i32_0 = arith.constant 0 : i32
    return %arg0, %c0_i32 : i32, i32
  }
  func.func @transform_1(%arg0: i32) -> (i32, i32) {
    %c0_i32 = arith.constant 0 : i32
    %c0_i32_0 = arith.constant 0 : i32
    %c0_i32_1 = arith.constant 0 : i32
    return %c0_i32, %c0_i32_0 : i32, i32
  }
  func.func @transform_2(%arg0: i32) -> (i32, i32) {
    %c0_i32 = arith.constant 0 : i32
    %c0_i32_0 = arith.constant 0 : i32
    %c0_i32_1 = arith.constant 0 : i32
    return %c0_i32, %c0_i32_0 : i32, i32
  }
  func.func @transform_3(%arg0: i32) -> (i32, i32) {
    %c0_i32 = arith.constant 0 : i32
    %c0_i32_0 = arith.constant 0 : i32
    return %arg0, %c0_i32 : i32, i32
  }
}

</mosaic_0001>

<bundles_post_ra>
// kernel: patch_embed.1
= control target key start
LH: loop header
LB: loop body
LE: loop exit
PB: predicated region body
PF: predicated region fallthrough
CT: control target
= control target key end

     0   :  { %vm69_vm0 = vcmask 523264   ;;  %s285_s0 = inlined_call_operand.vmem [shape: bf16[32,64], index: 0, kind: input, shape index: {}]   ;;  %s286_s1 = inlined_call_operand.vmem [shape: bf16[64,128], index: 1, kind: input, shape index: {}]   ;;  %s287_s2 = inlined_call_operand.vmem [shape: f32[1,128], index: 2, kind: input, shape index: {}]   ;;  %s288_s3 = inlined_call_operand.hbm [shape: bf16[32,128], index: 3, kind: output, shape index: {}]  }
   0x1   :  { %v210_v0 = vld [vmem:[%s286_s1 + $0x18] sm:$0xff]   ;;  %v211_v1 = vld [vmem:[%s286_s1 + $0x10] sm:$0xff]   ;;  %v212_v2 = vld [vmem:[%s286_s1 + $0x8] sm:$0xff]  }
   0x2   :  { %195 = vmatprep.subr.bf16.mxu0 %v210_v0  ;;  %v214_v3 = vld [vmem:[%s285_s0] sm:$0xff]  }
   0x3   :  { %196 = vmatpush3.bf16.msra.mxu0 %v210_v0  ;;  %203 = vmatprep.mubr.msk.bf16.mxu0 %vm69_vm0, %v214_v3 }
   0x4   :  { %197 = vmatprep.subr.bf16.mxu0 %v211_v1 }
   0x5   :  { %8 = vsyncpa [#allocation3], 0  ;;  %v213_v4 = vld [vmem:[%s286_s1] sm:$0xff]   ;;  %v215_v5 = vld [vmem:[%s285_s0 + $0x8] sm:$0xff]   ;;  %s238_s26 = smov [#allocation2]  }
   0x6   :  { %v161_v7 = vld [vmem:[%s287_s2] ss:$0 sm:$0xff]  ;;  %s150_s27 = sshll.u32 %s238_s26, 4  ;;  %s151_s27 = int_to_ptr.vmem [resolvable:$true] %s150_s27 }
   0x7   :  { %198 = vmatpush3.bf16.msra.mxu0 %v211_v1  ;;  %s216_s0 = scalar_lea.vmem %s151_s27, 256  ;;  %p221_p1 = scmp.lt.s32.totalorder %s151_s27, %s151_s27 }
   0x8   :  { %199 = vmatprep.subr.bf16.mxu0 %v212_v2  ;;  %p217_p0 = scmp.ne.s32.totalorder %s151_s27, %s216_s0  ;;  %p222_p2 = scmp.lt.s32.totalorder %s216_s0, %s216_s0 }
   0xa   :  { %p223_p3 = por %p222_p2, %p221_p1 }
   0xb   :  { %200 = vmatpush3.bf16.msra.mxu0 %v212_v2 }
   0xc   :  { %201 = vmatprep.subr.bf16.mxu0 %v213_v4  ;;  %p224_p4 = pnand %p223_p3, %p217_p0 }
   0xf   :  { %202 = vmatpush3.bf16.msra.mxu0 %v213_v4 }
  0x12   :  { %204 = vmatmul.mubr.msk.bf16.vlgmr.msra.gmra.mxu0 %vm69_vm0, %v215_v5 }
  0xd2   :  { %v205_v6 = vpop.f32.mrf.mxu0 }
  0xd3   :  { %v119_v10 = vadd.f32 %v205_v6, %v161_v7 }
  0xd4   :  { %v110_v8 = vpop.f32.mrf.mxu0 }
  0xd5   :  { %v111_v13 = vadd.f32 %v161_v7, %v110_v8 }
  0xd6   :  { %v206_v9 = vpop.f32.mrf.mxu0 }
  0xd7   :  { %v122_v11 = vadd.f32 %v206_v9, %v161_v7 }
  0xd8   :  { %v113_v12 = vpop.f32.mrf.mxu0 }
  0xd9   :  { %v186_v14 = vpack.c.bf16 %v122_v11, %v119_v10  ;;  %v114_v15 = vadd.f32 %v161_v7, %v113_v12 }
  0xdb   :  { %188 = vst [vmem:[#allocation2 + $0x8] sm:$0xff] %v186_v14   ;;  %v181_v16 = vpack.c.bf16 %v114_v15, %v111_v13 }
  0xdd   :  { %182 = vst [vmem:[#allocation2] sm:$0xff] %v181_v16  }
  0xde   :  { %227 = shalt.err (!%p224_p4)
}
  0xdf   :  { %s239_s1 = smov 64   ;;  %s240_s2 = smov 4  }
  0xe0   :  { %156 = dma.vmem_to_hbm [thread:$0]  %s151_s27, 256, %s288_s3, [#allocation3], %s239_s1, %s239_s1, %s240_s2  }
  0xe1   :  { %236 = dma.done.wait [#allocation3], 256  }
  0xe2   :  { %237 = vsyncadd [#allocation3], 4294967040 }
  0xe3   :  { %160 = vsyncpa [#allocation3], 1 }

</bundles_post_ra>
